<compile_context>
chip_gen: v6e
topology: v6e:2x2x1
jax: 0.10.0
libtpu: 0.0.40
codegen_flags: <defaults>
</compile_context>

<pallas_src>
import jax
import jax.numpy as jnp
from jax.experimental import pallas as pl
from jax.experimental.pallas import tpu as pltpu


# -----------------------------------------------------------------------------
# Kernel 1: ConvTranspose3d(Cin -> C, kernel=2, stride=2, padding=0).
# stride == kernel => no tap overlap.  For grid point (n, d) the kernel emits the
# two upsampled depth slices 2d and 2d+1 directly in the (H2, W2*C) lane-dense
# layout that the CBR kernel consumes.  The W/r scatter is folded into the
# U[p, q] weight matrices ((W*Cin, W2*C)); the H/q row interleave is done with a
# tiny 0/1 scatter matmul S[q] ((H2, H)) so no in-kernel relayouts are needed.
# -----------------------------------------------------------------------------
def _deconv_kernel(x_ref, u_ref, s_ref, b_ref, o_ref):
    # x_ref: (H, W*Cin)   u_ref: (2, 2, W*Cin, W2*C)   s_ref: (2, H2, H)
    # b_ref: (1, W2*C)    o_ref: (2, H2, W2*C)  -- output depths 2d, 2d+1
    x = x_ref[...]
    bias = b_ref[...]
    for p in range(2):                       # depth tap of the 2x2x2 kernel
        acc = jnp.zeros(o_ref.shape[1:], jnp.float32)
        for q in range(2):                   # row (H) tap
            rows = jnp.dot(x, u_ref[p, q],
                           preferred_element_type=jnp.float32)        # (H, W2*C)
            acc = acc + jnp.dot(s_ref[q], rows,
                                preferred_element_type=jnp.float32)   # (H2, W2*C)
        o_ref[p] = (acc + bias).astype(o_ref.dtype)


# -----------------------------------------------------------------------------
# Kernel 2: CBR = Conv3d(C -> C, 3x3x3, stride 1, "same") + folded BN + ReLU.
# Input is the zero-padded intermediate (D2+2, H2+2, (W2+2)*C) resident per n
# (read from HBM exactly once).  For each output depth d, the conv is 9 matmuls
# (one per (kd, kh)): rows (H2, (W2+2)*C) @ block-Toeplitz T[kd,kh]
# ((W2+2)*C, W2*C); the kw taps and the channel contraction are inside T, so the
# lane axis stays dense and no per-tap vreg relayouts are generated.
# -----------------------------------------------------------------------------
def _cbr_kernel(xp_ref, t_ref, s_ref, b_ref, o_ref):
    # xp_ref: (D2+2, H2+2, WP2C)   t_ref: (9, WP2C, W2C)
    # s_ref, b_ref: (1, W2C)       o_ref: (D2, H2, W2C)
    D2, H2, W2C = o_ref.shape
    scale = s_ref[...]
    shift = b_ref[...]

    def body(d, carry):
        acc = jnp.zeros((H2, W2C), jnp.float32)
        for kd in range(3):
            slab = xp_ref.at[d + kd]                      # ref view (H2+2, WP2C)
            for kh in range(3):
                rows = slab[pl.ds(kh, H2), :]             # (H2, WP2C) offset load
                acc = acc + jnp.dot(rows, t_ref[kd * 3 + kh],
                                    preferred_element_type=jnp.float32)
        # folded BN + conv bias + ReLU, f32 epilogue, cast only at the store
        o_ref[d] = jnp.maximum(acc * scale + shift, 0.0).astype(o_ref.dtype)
        return carry

    jax.lax.fori_loop(0, D2, body, 0)


def prior_decoder_forward(x, params, *, eps=1e-5, vmem_limit=32 * 1024 * 1024):
    """x: (N, Cin, D, H, W) NCDHW.  Returns (N, C, 2D, 2H, 2W)."""
    N, Cin, D, H, W = x.shape
    w1 = params["w1"]                                  # (Cin, C, 2, 2, 2) torch layout
    C = w1.shape[1]
    D2, H2, W2 = 2 * D, 2 * H, 2 * W
    WCin = W * Cin
    W2C = W2 * C                                       # lane-dense last dim (128 here)
    WP2C = (W2 + 2) * C
    dtype = x.dtype
    itemsize = jnp.dtype(dtype).itemsize

    # channels-last with W folded into the lane axis
    x_cl = jnp.transpose(x, (0, 2, 3, 4, 1)).reshape(N, D, H, WCin)

    # ---------------- stage-1 weights: fold the 2x2x2 scatter into the matmuls ----
    # U[p, q][w*Cin + ci, (2w+r)*C + co] = w1[ci, co, p, q, r]
    w_idx = jnp.arange(W)[:, None, None]
    r_idx = jnp.arange(2)[None, :, None]
    v_idx = jnp.arange(W2)[None, None, :]
    Sdec = (v_idx == 2 * w_idx + r_idx).astype(dtype)                 # (W, 2, W2)
    w1t = jnp.transpose(w1, (2, 3, 4, 0, 1)).astype(dtype)            # (p,q,r,ci,co)
    U = jnp.einsum("wrv,pqric->pqwivc", Sdec, w1t).reshape(2, 2, WCin, W2C)
    # S[q][2h+q, h] = 1  -- interleaves the two H parities into one depth slice
    q_idx = jnp.arange(2)[:, None, None]
    h2_idx = jnp.arange(H2)[None, :, None]
    h_idx = jnp.arange(H)[None, None, :]
    Srow = (h2_idx == 2 * h_idx + q_idx).astype(dtype)                # (2, H2, H)
    b_row = jnp.tile(params["b1"].astype(jnp.float32), W2).reshape(1, W2C)

    y1 = pl.pallas_call(
        _deconv_kernel,
        out_shape=jax.ShapeDtypeStruct((N, D2, H2, W2C), dtype),
        grid_spec=pltpu.PrefetchScalarGridSpec(
            num_scalar_prefetch=0,
            grid=(N, D),
            in_specs=[
                pl.BlockSpec((None, None, H, WCin), lambda n, d: (n, d, 0, 0)),
                pl.BlockSpec((2, 2, WCin, W2C), lambda n, d: (0, 0, 0, 0)),
                pl.BlockSpec((2, H2, H), lambda n, d: (0, 0, 0)),
                pl.BlockSpec((1, W2C), lambda n, d: (0, 0)),
            ],
            # writes depth slices 2d and 2d+1 directly into stage-2's layout
            out_specs=pl.BlockSpec((None, 2, H2, W2C), lambda n, d: (n, d, 0, 0)),
        ),
        compiler_params=pltpu.CompilerParams(
            dimension_semantics=("parallel", "parallel"),
            vmem_limit_bytes=vmem_limit,
        ),
        cost_estimate=pl.CostEstimate(
            flops=2 * N * D * 2 * (H * WCin * W2C + H2 * H * W2C),
            transcendentals=0,
            bytes_accessed=(N * D * H * WCin + 4 * WCin * W2C + 2 * H2 * H
                            + W2C + N * D2 * H2 * W2C) * itemsize,
        ),
    )(x_cl, U, Srow, b_row)

    # ---------------- stage 2: CBR --------------------------------------------
    # single halo pad (D, H by 1; W by one position == C flat elements)
    y1p = jnp.pad(y1, ((0, 0), (1, 1), (1, 1), (C, C)))

    # block-Toeplitz conv weights, one per (kd, kh):
    # T[kd, kh][(w+kw)*C + ci, w*C + co] = w2[co, ci, kd, kh, kw]
    a_idx = jnp.arange(W2 + 2)[:, None, None]
    kw_idx = jnp.arange(3)[None, :, None]
    wo_idx = jnp.arange(W2)[None, None, :]
    S_w = (a_idx == wo_idx + kw_idx).astype(dtype)                    # (W2+2, 3, W2)
    wt = jnp.transpose(params["w2"], (2, 3, 4, 1, 0)).astype(dtype)   # (kd,kh,kw,ci,co)
    T = jnp.einsum("akw,dhkic->dhaiwc", S_w, wt).reshape(9, WP2C, W2C)

    scale = (params["gamma"] / jnp.sqrt(params["var"] + eps)).astype(jnp.float32)
    shift = (params["beta"] - params["mean"] * scale
             + params["b2"] * scale).astype(jnp.float32)              # conv bias folded
    s_row = jnp.tile(scale, W2).reshape(1, W2C)
    t_row = jnp.tile(shift, W2).reshape(1, W2C)

    y2 = pl.pallas_call(
        _cbr_kernel,
        out_shape=jax.ShapeDtypeStruct((N, D2, H2, W2C), dtype),
        grid_spec=pltpu.PrefetchScalarGridSpec(
            num_scalar_prefetch=0,
            grid=(N,),   # for N=1 workloads split D2 across cores instead (v7x)
            in_specs=[
                pl.BlockSpec((None, D2 + 2, H2 + 2, WP2C), lambda n: (n, 0, 0, 0)),
                pl.BlockSpec((9, WP2C, W2C), lambda n: (0, 0, 0)),
                pl.BlockSpec((1, W2C), lambda n: (0, 0)),
                pl.BlockSpec((1, W2C), lambda n: (0, 0)),
            ],
            out_specs=pl.BlockSpec((None, D2, H2, W2C), lambda n: (n, 0, 0, 0)),
        ),
        compiler_params=pltpu.CompilerParams(
            dimension_semantics=("parallel",),
            vmem_limit_bytes=vmem_limit,
        ),
        cost_estimate=pl.CostEstimate(
            flops=2 * N * D2 * 9 * H2 * WP2C * W2C,
            transcendentals=0,
            bytes_accessed=(N * (D2 + 2) * (H2 + 2) * WP2C + 9 * WP2C * W2C
                            + 2 * W2C + N * D2 * H2 * W2C) * itemsize,
        ),
    )(y1p, T, s_row, t_row)

    # back to NCDHW
    return jnp.transpose(y2.reshape(N, D2, H2, W2, C), (0, 4, 1, 2, 3))


def init_prior_decoder_params(key, in_channels, channels, dtype=jnp.float32):
    """Deterministic synthetic params (torch layouts, inference-mode BN stats)."""
    Cin, C = in_channels, channels
    ks = jax.random.split(key, 8)
    w1 = 0.1 * jax.random.normal(ks[0], (Cin, C, 2, 2, 2), dtype)   # ConvTranspose3d
    b1 = 0.1 * jax.random.normal(ks[1], (C,), dtype)
    w2 = 0.05 * jax.random.normal(ks[2], (C, C, 3, 3, 3), dtype)    # Conv3d (CBR)
    b2 = 0.1 * jax.random.normal(ks[3], (C,), dtype)
    gamma = 1.0 + 0.1 * jax.random.normal(ks[4], (C,), dtype)
    beta = 0.1 * jax.random.normal(ks[5], (C,), dtype)
    mean = 0.05 * jax.random.normal(ks[6], (C,), dtype)
    var = 1.0 + 0.1 * jnp.abs(jax.random.normal(ks[7], (C,), dtype))
    return dict(w1=w1, b1=b1, w2=w2, b2=b2, gamma=gamma, beta=beta,
                mean=mean, var=var)


def prior_decoder_reference(x, params, eps=1e-5):
    """Pure-JAX reference for the correctness check."""
    N, Cin, D, H, W = x.shape
    w1, b1 = params["w1"], params["b1"]
    C = w1.shape[1]
    # ConvTranspose3d kernel=2, stride=2, padding=0 (no tap overlap).
    y = jnp.einsum("ncdhw,copqr->nodphqwr", x, w1,
                   precision=jax.lax.Precision.HIGHEST)
    y = y.reshape(N, C, 2 * D, 2 * H, 2 * W) + b1[None, :, None, None, None]
    # CBR: Conv3d 3x3x3, stride 1, padding 1 + inference BatchNorm + ReLU.
    z = jax.lax.conv_general_dilated(
        y, params["w2"], window_strides=(1, 1, 1),
        padding=((1, 1), (1, 1), (1, 1)),
        dimension_numbers=("NCDHW", "OIDHW", "NCDHW"),
        precision=jax.lax.Precision.HIGHEST)
    z = z + params["b2"][None, :, None, None, None]
    scale = params["gamma"] / jnp.sqrt(params["var"] + eps)
    z = (z - params["mean"][None, :, None, None, None]) \
        * scale[None, :, None, None, None] \
        + params["beta"][None, :, None, None, None]
    return jnp.maximum(z, 0.0)


if __name__ == "__main__":
    key = jax.random.PRNGKey(0)
    kx, kp = jax.random.split(key)

    # PriorDecoder(in_channels=4, channels=8); x: (N, Cin, D, H, W)
    N, Cin, C, D, H, W = 2, 4, 8, 8, 8, 8
    x = jax.random.normal(kx, (N, Cin, D, H, W), jnp.float32)
    params = init_prior_decoder_params(kp, Cin, C)

    out = jax.block_until_ready(prior_decoder_forward(x, params))
    ref = jax.block_until_ready(prior_decoder_reference(x, params))

    assert out.shape == (N, C, 2 * D, 2 * H, 2 * W), out.shape
    max_err = float(jnp.max(jnp.abs(out - ref)))
    assert jnp.allclose(out, ref, atol=1e-4, rtol=1e-4), max_err
    print("KERNEL_OK")
</pallas_src>

<mosaic_0001>
module attributes {stable_mosaic.version = 11 : i64} {
  func.func @_deconv_kernel(%arg0: i32, %arg1: i32, %arg2: memref<1x1x8x32xf32, #tpu.memory_space<vmem>>, %arg3: memref<2x2x32x128xf32, #tpu.memory_space<vmem>>, %arg4: memref<2x16x8xf32, #tpu.memory_space<vmem>>, %arg5: memref<1x128xf32, #tpu.memory_space<vmem>>, %arg6: memref<1x2x16x128xf32, #tpu.memory_space<vmem>>) attributes {dimension_semantics = [#tpu.dimension_semantics<parallel>, #tpu.dimension_semantics<parallel>], iteration_bounds = array<i64: 2, 8>, scalar_prefetch = 0 : i64, scratch_operands = 0 : i64, tpu.core_type = #tpu.core_type<tc>, window_params = [{transform_indices = @transform_0, window_bounds = array<i64: 1, 1, 8, 32>}, {pipeline_mode = #tpu.pipeline_mode<synchronous>, transform_indices = @transform_1, window_bounds = array<i64: 2, 2, 32, 128>}, {pipeline_mode = #tpu.pipeline_mode<synchronous>, transform_indices = @transform_2, window_bounds = array<i64: 2, 16, 8>}, {pipeline_mode = #tpu.pipeline_mode<synchronous>, transform_indices = @transform_3, window_bounds = array<i64: 1, 128>}, {transform_indices = @transform_4, window_bounds = array<i64: 1, 2, 16, 128>}]} {
    %c0 = arith.constant 0 : index
    %c0_0 = arith.constant 0 : index
    %c0_1 = arith.constant 0 : index
    %c0_2 = arith.constant 0 : index
    %0 = vector.load %arg2[%c0, %c0_0, %c0_1, %c0_2] : memref<1x1x8x32xf32, #tpu.memory_space<vmem>>, vector<1x1x8x32xf32>
    %1 = vector.shape_cast %0 : vector<1x1x8x32xf32> to vector<8x32xf32>
    %c0_3 = arith.constant 0 : index
    %c0_4 = arith.constant 0 : index
    %2 = vector.load %arg5[%c0_3, %c0_4] : memref<1x128xf32, #tpu.memory_space<vmem>>, vector<1x128xf32>
    %cst = arith.constant 0.000000e+00 : f32
    %3 = vector.broadcast %cst : f32 to vector<16x128xf32>
    %c0_5 = arith.constant 0 : index
    %c0_6 = arith.constant 0 : index
    %c0_7 = arith.constant 0 : index
    %c0_8 = arith.constant 0 : index
    %4 = vector.load %arg3[%c0_5, %c0_6, %c0_7, %c0_8] : memref<2x2x32x128xf32, #tpu.memory_space<vmem>>, vector<1x1x32x128xf32>
    %5 = vector.shape_cast %4 : vector<1x1x32x128xf32> to vector<32x128xf32>
    %cst_9 = arith.constant dense<0.000000e+00> : vector<8x128xf32>
    %6 = tpu.matmul %1, %5, %cst_9 {dimension_numbers = #tpu.dot_dimension_numbers<[1], [0], [0], [1], [0, 0, 1, 1], [], []>} : vector<8x32xf32>, vector<32x128xf32>, vector<8x128xf32> -> vector<8x128xf32>
    %c0_10 = arith.constant 0 : index
    %c0_11 = arith.constant 0 : index
    %c0_12 = arith.constant 0 : index
    %7 = vector.load %arg4[%c0_10, %c0_11, %c0_12] : memref<2x16x8xf32, #tpu.memory_space<vmem>>, vector<1x16x8xf32>
    %8 = vector.shape_cast %7 : vector<1x16x8xf32> to vector<16x8xf32>
    %cst_13 = arith.constant dense<0.000000e+00> : vector<16x128xf32>
    %9 = tpu.matmul %8, %6, %cst_13 {dimension_numbers = #tpu.dot_dimension_numbers<[1], [0], [0], [1], [0, 0, 1, 1], [], []>} : vector<16x8xf32>, vector<8x128xf32>, vector<16x128xf32> -> vector<16x128xf32>
    %10 = arith.addf %3, %9 : vector<16x128xf32>
    %c0_14 = arith.constant 0 : index
    %c1 = arith.constant 1 : index
    %c0_15 = arith.constant 0 : index
    %c0_16 = arith.constant 0 : index
    %11 = vector.load %arg3[%c0_14, %c1, %c0_15, %c0_16] : memref<2x2x32x128xf32, #tpu.memory_space<vmem>>, vector<1x1x32x128xf32>
    %12 = vector.shape_cast %11 : vector<1x1x32x128xf32> to vector<32x128xf32>
    %cst_17 = arith.constant dense<0.000000e+00> : vector<8x128xf32>
    %13 = tpu.matmul %1, %12, %cst_17 {dimension_numbers = #tpu.dot_dimension_numbers<[1], [0], [0], [1], [0, 0, 1, 1], [], []>} : vector<8x32xf32>, vector<32x128xf32>, vector<8x128xf32> -> vector<8x128xf32>
    %c1_18 = arith.constant 1 : index
    %c0_19 = arith.constant 0 : index
    %c0_20 = arith.constant 0 : index
    %14 = vector.load %arg4[%c1_18, %c0_19, %c0_20] : memref<2x16x8xf32, #tpu.memory_space<vmem>>, vector<1x16x8xf32>
    %15 = vector.shape_cast %14 : vector<1x16x8xf32> to vector<16x8xf32>
    %cst_21 = arith.constant dense<0.000000e+00> : vector<16x128xf32>
    %16 = tpu.matmul %15, %13, %cst_21 {dimension_numbers = #tpu.dot_dimension_numbers<[1], [0], [0], [1], [0, 0, 1, 1], [], []>} : vector<16x8xf32>, vector<8x128xf32>, vector<16x128xf32> -> vector<16x128xf32>
    %17 = arith.addf %10, %16 : vector<16x128xf32>
    %18 = vector.broadcast %2 : vector<1x128xf32> to vector<16x128xf32>
    %19 = arith.addf %17, %18 : vector<16x128xf32>
    %c0_22 = arith.constant 0 : index
    %c0_23 = arith.constant 0 : index
    %c0_24 = arith.constant 0 : index
    %c0_25 = arith.constant 0 : index
    %20 = vector.load %arg6[%c0_22, %c0_23, %c0_24, %c0_25] : memref<1x2x16x128xf32, #tpu.memory_space<vmem>>, vector<1x1x16x128xf32>
    %21 = vector.shape_cast %20 : vector<1x1x16x128xf32> to vector<16x128xf32>
    %22 = vector.shape_cast %19 : vector<16x128xf32> to vector<1x1x16x128xf32>
    tpu.vector_store %arg6[%c0_22, %c0_23, %c0_24, %c0_25], %22 {strides = array<i32>} : memref<1x2x16x128xf32, #tpu.memory_space<vmem>>, vector<1x1x16x128xf32>,
    %cst_26 = arith.constant 0.000000e+00 : f32
    %23 = vector.broadcast %cst_26 : f32 to vector<16x128xf32>
    %c1_27 = arith.constant 1 : index
    %c0_28 = arith.constant 0 : index
    %c0_29 = arith.constant 0 : index
    %c0_30 = arith.constant 0 : index
    %24 = vector.load %arg3[%c1_27, %c0_28, %c0_29, %c0_30] : memref<2x2x32x128xf32, #tpu.memory_space<vmem>>, vector<1x1x32x128xf32>
    %25 = vector.shape_cast %24 : vector<1x1x32x128xf32> to vector<32x128xf32>
    %cst_31 = arith.constant dense<0.000000e+00> : vector<8x128xf32>
    %26 = tpu.matmul %1, %25, %cst_31 {dimension_numbers = #tpu.dot_dimension_numbers<[1], [0], [0], [1], [0, 0, 1, 1], [], []>} : vector<8x32xf32>, vector<32x128xf32>, vector<8x128xf32> -> vector<8x128xf32>
    %c0_32 = arith.constant 0 : index
    %c0_33 = arith.constant 0 : index
    %c0_34 = arith.constant 0 : index
    %27 = vector.load %arg4[%c0_32, %c0_33, %c0_34] : memref<2x16x8xf32, #tpu.memory_space<vmem>>, vector<1x16x8xf32>
    %28 = vector.shape_cast %27 : vector<1x16x8xf32> to vector<16x8xf32>
    %cst_35 = arith.constant dense<0.000000e+00> : vector<16x128xf32>
    %29 = tpu.matmul %28, %26, %cst_35 {dimension_numbers = #tpu.dot_dimension_numbers<[1], [0], [0], [1], [0, 0, 1, 1], [], []>} : vector<16x8xf32>, vector<8x128xf32>, vector<16x128xf32> -> vector<16x128xf32>
    %30 = arith.addf %23, %29 : vector<16x128xf32>
    %c1_36 = arith.constant 1 : index
    %c1_37 = arith.constant 1 : index
    %c0_38 = arith.constant 0 : index
    %c0_39 = arith.constant 0 : index
    %31 = vector.load %arg3[%c1_36, %c1_37, %c0_38, %c0_39] : memref<2x2x32x128xf32, #tpu.memory_space<vmem>>, vector<1x1x32x128xf32>
    %32 = vector.shape_cast %31 : vector<1x1x32x128xf32> to vector<32x128xf32>
    %cst_40 = arith.constant dense<0.000000e+00> : vector<8x128xf32>
    %33 = tpu.matmul %1, %32, %cst_40 {dimension_numbers = #tpu.dot_dimension_numbers<[1], [0], [0], [1], [0, 0, 1, 1], [], []>} : vector<8x32xf32>, vector<32x128xf32>, vector<8x128xf32> -> vector<8x128xf32>
    %c1_41 = arith.constant 1 : index
    %c0_42 = arith.constant 0 : index
    %c0_43 = arith.constant 0 : index
    %34 = vector.load %arg4[%c1_41, %c0_42, %c0_43] : memref<2x16x8xf32, #tpu.memory_space<vmem>>, vector<1x16x8xf32>
    %35 = vector.shape_cast %34 : vector<1x16x8xf32> to vector<16x8xf32>
    %cst_44 = arith.constant dense<0.000000e+00> : vector<16x128xf32>
    %36 = tpu.matmul %35, %33, %cst_44 {dimension_numbers = #tpu.dot_dimension_numbers<[1], [0], [0], [1], [0, 0, 1, 1], [], []>} : vector<16x8xf32>, vector<8x128xf32>, vector<16x128xf32> -> vector<16x128xf32>
    %37 = arith.addf %30, %36 : vector<16x128xf32>
    %38 = vector.broadcast %2 : vector<1x128xf32> to vector<16x128xf32>
    %39 = arith.addf %37, %38 : vector<16x128xf32>
    %c0_45 = arith.constant 0 : index
    %c1_46 = arith.constant 1 : index
    %c0_47 = arith.constant 0 : index
    %c0_48 = arith.constant 0 : index
    %40 = vector.load %arg6[%c0_45, %c1_46, %c0_47, %c0_48] : memref<1x2x16x128xf32, #tpu.memory_space<vmem>>, vector<1x1x16x128xf32>
    %41 = vector.shape_cast %40 : vector<1x1x16x128xf32> to vector<16x128xf32>
    %42 = vector.shape_cast %39 : vector<16x128xf32> to vector<1x1x16x128xf32>
    tpu.vector_store %arg6[%c0_45, %c1_46, %c0_47, %c0_48], %42 {strides = array<i32>} : memref<1x2x16x128xf32, #tpu.memory_space<vmem>>, vector<1x1x16x128xf32>,
    return
  }
  func.func @transform_0(%arg0: i32, %arg1: i32) -> (i32, i32, i32, i32) {
    %c0_i32 = arith.constant 0 : i32
    %c0_i32_0 = arith.constant 0 : i32
    %c0_i32_1 = arith.constant 0 : i32
    return %arg0, %arg1, %c0_i32, %c0_i32_0 : i32, i32, i32, i32
  }
  func.func @transform_1(%arg0: i32, %arg1: i32) -> (i32, i32, i32, i32) {
    %c0_i32 = arith.constant 0 : i32
    %c0_i32_0 = arith.constant 0 : i32
    %c0_i32_1 = arith.constant 0 : i32
    %c0_i32_2 = arith.constant 0 : i32
    %c0_i32_3 = arith.constant 0 : i32
    return %c0_i32, %c0_i32_0, %c0_i32_1, %c0_i32_2 : i32, i32, i32, i32
  }
  func.func @transform_2(%arg0: i32, %arg1: i32) -> (i32, i32, i32) {
    %c0_i32 = arith.constant 0 : i32
    %c0_i32_0 = arith.constant 0 : i32
    %c0_i32_1 = arith.constant 0 : i32
    %c0_i32_2 = arith.constant 0 : i32
    return %c0_i32, %c0_i32_0, %c0_i32_1 : i32, i32, i32
  }
  func.func @transform_3(%arg0: i32, %arg1: i32) -> (i32, i32) {
    %c0_i32 = arith.constant 0 : i32
    %c0_i32_0 = arith.constant 0 : i32
    %c0_i32_1 = arith.constant 0 : i32
    return %c0_i32, %c0_i32_0 : i32, i32
  }
  func.func @transform_4(%arg0: i32, %arg1: i32) -> (i32, i32, i32, i32) {
    %c0_i32 = arith.constant 0 : i32
    %c0_i32_0 = arith.constant 0 : i32
    %c0_i32_1 = arith.constant 0 : i32
    return %arg0, %arg1, %c0_i32, %c0_i32_0 : i32, i32, i32, i32
  }
}

</mosaic_0001>

<bundles_post_ra>
// kernel: tpu_custom_call.1
= control target key start
LH: loop header
LB: loop body
LE: loop exit
PB: predicated region body
PF: predicated region fallthrough
CT: control target
= control target key end

     0   :  { %s1686_s0 = inlined_call_operand.hbm [shape: f32[2,8,8,32], index: 0, kind: input, shape index: {}]   ;;  %s1687_s1 = inlined_call_operand.hbm [shape: f32[2,2,32,128], index: 1, kind: input, shape index: {}]   ;;  %s1688_s2 = inlined_call_operand.vmem [shape: f32[2,16,8], index: 2, kind: input, shape index: {}]   ;;  %s1689_s3 = inlined_call_operand.vmem [shape: f32[1,128], index: 3, kind: input, shape index: {}]   ;;  %s1690_s4 = inlined_call_operand.hbm [shape: f32[2,16,16,128], index: 4, kind: output, shape index: {}]  }
   0x1   :  { %1698 = sst [smem:[#allocation15_spill]] %s1687_s1 }
   0x2   :  { %1699 = sst [smem:[#allocation16_spill]] %s1690_s4 }
   0x3   :  { %9 = vsyncpa [#allocation3], 0 }
   0x4   :  { %11 = vsyncpa [#allocation3 + $0x1], 0 }
   0x5   :  { %12 = vsyncpa [#allocation6], 0 }
   0x6   :  { %13 = vsyncpa [#allocation4], 0 }
   0x7   :  { %15 = vsyncpa [#allocation4 + $0x1], 0  ;;  %s1437_s15 = smov 0   ;;  %s1439_s16 = smov 0  }
   0x8   :  { %s1441_s17 = smov 0   ;;  %s1443_s18 = smov 0  }
   0x9   :  { %s1445_s19 = smov 0   ;;  %s1447_s20 = smov 0  }
   0xa   :  { %s1449_s21 = smov 0   ;;  %s1451_s22 = smov 0  }
   0xb LB: > { %1700 = sst [smem:[#allocation11_spill]] %s1373_s15  ;;  %s1017_s23 = sadd.s32 4294967295, %s1401_s22   ;;  %s1401_s22 = sphi %s1451_s22, %s21_s22   ;;  %s1397_s21 = sphi %s1449_s21, %s1727_s21   ;;  %s1393_s20 = sphi %s1447_s20, %s1726_s20   ;;  %s1389_s19 = sphi %s1445_s19, %s1725_s19   ;;  %s1385_s18 = sphi %s1443_s18, %s1724_s18   ;;  %s1381_s17 = sphi %s1441_s17, %s1723_s17   ;;  %s1377_s16 = sphi %s1439_s16, %s1722_s16   ;;  %s1373_s15 = sphi %s1437_s15, %s1721_s15  }
   0xc   : > { %s1018_s24 = sadd.s32 4294967294, %s1401_s22   ;;  %p55_p0 = scmp.ne.s32.totalorder %s1377_s16, %s1373_s15 }
   0xd   : > { %p1481_p1 = scmp.eq.s32.totalorder %s1017_s23, 0  ;;  %p1485_p2 = scmp.eq.s32.totalorder %s1017_s23, 15 }
   0xe   : > { %p150_p3 = scmp.eq.s32.totalorder %s1018_s24, 15  ;;  %p1019_p5 = scmp.ge.s32.totalorder %s1401_s22, 1 }
   0xf   : > { %p1491_p4 = por %p1481_p1, %p55_p0  ;;  %p157_p7 = scmp.lt.s32.totalorder %s1401_s22, 17 }
  0x10   : > { %p1496_p6 = por %p150_p3, %p55_p0  ;;  %s1403_s30 = smov [#allocation5]  }
  0x11   : > { %s1703_s27 = scalar_select %p1491_p4, 1, 0 }
  0x12   : > { %s1704_s28 = scalar_select %p1496_p6, 1, 0 }
  0x13   : > { %p1501_p8 = pnand %p1019_p5, %p157_p7  ;;  %s169_s5 = sshll.u32 %s1403_s30, 4  ;;  %s170_s5 = int_to_ptr.vmem [resolvable:$true] %s169_s5 }
  0x14   : > { %1705 = sst [smem:[#allocation12_spill]] %s1704_s28  ;;  %s1258_s6 = scalar_lea.vmem %s170_s5, 2048 }
  0x15   : > { %p1160_p9 = pneg %p1501_p8  ;;  %p1259_p12 = scmp.ne.s32.totalorder %s170_s5, %s1258_s6 }
  0x16   : > { %p1266_p3 = scmp.lt.s32.totalorder %s170_s5, %s170_s5  ;;  %p1267_p6 = scmp.lt.s32.totalorder %s1258_s6, %s1258_s6 }
  0x17   : > { %p1161_p10 = pnand %p1160_p9, %p1481_p1 }
  0x18   : > { %p1268_p4 = por %p1267_p6, %p1266_p3 }
  0x19   : > { %p1249_p11 = pneg %p1161_p10 }
  0x1b   : > { %p1261_p13 = pnand %p1259_p12, %p1249_p11 }
  0x1d   : > { %p1262_p0 = pneg %p1261_p13 }
  0x1f   : > { %p1269_p5 = pnand %p1268_p4, %p1262_p0 }
  0x21   : > { %1272 = shalt.err (!%p1269_p5)
}
  0x22   : > { %s1404_s7 = smov 128   ;;  %s1405_s8 = smov 8  }
  0x23   : > { %s1707_s1 = sld [smem:[#allocation15_spill]]  ;;  %s30_s11 = sadd.s32 1, %s1393_s20 }
  0x24   : > { %p31_p4 = scmp.ge.s32.totalorder %s30_s11, 8  ;;  %s33_s12 = sadd.s32 1, %s1397_s21 }
  0x25   : > { %s42_s13 = sadd.s32 1, %s1381_s17  ;;  %p49_p6 = scmp.ne.s32.totalorder %s1381_s17, %s1377_s16 }
  0x26   : > { %s1729_s11 = smov (%p31_p4, %s30_s11), 0  ;;  %s1731_s12 = smov (!%p31_p4, %s33_s12), %s1397_s21 }
  0x27   : > { %1708 = sst [smem:[#allocation13_spill]] %s1729_s11  ;;  %s38_s14 = ssub.s32 %s1393_s20, %s1729_s11 }
  0x28   : > { %p50_p7 = scmp.eq.s32.totalorder %s1401_s22, 0  ;;  %p35_p9 = scmp.ge.s32.totalorder %s1731_s12, 2 }
  0x29   : > { %1163 = dma.hbm_to_vmem [thread:$0]  (!%p1161_p10), %s1707_s1, 2048, %s170_s5, [#allocation6], %s1404_s7, %s1404_s7, %s1405_s8  }
  0x2a   : > { %p1525_p11 = por %p1485_p2, %p49_p6  ;;  %p1529_p10 = por %p50_p7, %p49_p6 }
  0x2b   : > { %p1173_p12 = scmp.lt.s32.totalorder %s1401_s22, 16  ;;  %s1733_s12 = smov (%p35_p9, %s1731_s12), 0 }
  0x2c   : > { %s1709_s23 = scalar_select %p1525_p11, 1, 0 }
  0x2d   : > { %s189_s30 = sand.u32 1, %s1381_s17   ;;  %s1023_s5 = sshll.u32 %s1397_s21, 3 }
  0x2e   : > { %1710 = sst [smem:[#allocation14_spill]] %s1709_s23  ;;  %s37_s6 = ssub.s32 %s1397_s21, %s1733_s12 }
  0x2f   : > { %s39_s7 = sor.u32 %s38_s14, %s37_s6  ;;  %s1022_s8 = sshll.u32 %s189_s30, 3 }
  0x30   : > { %p40_p13 = scmp.eq.s32.totalorder %s39_s7, 0  ;;  %s198_s26 = sadd.s32 %s1393_s20, %s1023_s5 }
  0x31   : > { %s193_s9 = scalar_lea.vmem [#allocation2], %s1022_s8  ;;  %s1024_s11 = sshll.u32 %s198_s26, 7 }
  0x32   : > { %s202_s10 = sshll.u32 %s193_s9, 4  ;;  %s200_s4 = scalar_lea.hbm %s1686_s0, %s1024_s11  ;;  %s203_s10 = int_to_ptr.vmem [resolvable:$true] %s202_s10 }
  0x33   : > { %s1542_s1 = scalar_select %p40_p13, %s1381_s17, %s42_s13  }
  0x34   : > { %p1551_p2 = pnand %p1173_p12, %p1529_p10  ;;  %s190_s14 = scalar_lea.sflag [#allocation3], %s189_s30 }
  0x35   : > { %s1286_s5 = scalar_lea.vmem %s203_s10, 128  ;;  %s1406_s13 = smov [#allocation2]  }
  0x36   : > { %p1275_p0 = pneg %p1551_p2  ;;  %p1287_p3 = scmp.ne.s32.totalorder %s203_s10, %s1286_s5 }
  0x37   : > { %s1291_s6 = sshll.u32 %s1406_s13, 4  ;;  %s1292_s6 = int_to_ptr.vmem [resolvable:$false] %s1291_s6 }
  0x38   : > { %p1289_p5 = pnand %p1287_p3, %p1275_p0  ;;  %s1293_s7 = scalar_lea.vmem %s1292_s6, 256 }
  0x39   : > { %p1294_p6 = scmp.lt.s32.totalorder %s203_s10, %s1292_s6  ;;  %p1295_p7 = scmp.lt.s32.totalorder %s1293_s7, %s1286_s5 }
  0x3a   : > { %p1290_p4 = pneg %p1289_p5 }
  0x3b   : > { %p1296_p9 = por %p1295_p7, %p1294_p6 }
  0x3d   : > { %p1297_p13 = pnand %p1296_p9, %p1290_p4 }
  0x3f   : > { %1300 = shalt.err (!%p1297_p13)
}
  0x40   : > { %1167 = dma.hbm_to_vmem [thread:$0]  (!%p1551_p2), %s200_s4, 128, %s203_s10, %s190_s14  }
  0x41   : > { %211 = sbr.rel (%p1501_p8) target bundleno = 696 (0x2b8), region = 36  ;;  %s1562_s15 = sand.u32 (!%p1501_p8), 1, %s1377_s16  }
  0x42   : > { %s1026_s28 = sshll.u32 (!%p1501_p8), %s1562_s15, 3  ;;  %s214_s11 = scalar_lea.sflag (!%p1501_p8), [#allocation3], %s1562_s15 }
  0x43   : > { %s217_s24 = scalar_lea.vmem (!%p1501_p8), [#allocation2], %s1026_s28  ;;  %p1713_p10 = scmp.ne.s32.totalorder (!%p1501_p8), %s1703_s27, 0 }
  0x46   : > { %1360 = dma.done.wait (%p1713_p10), %s214_s11, 128  }
  0x47   : > { %1362 = vsyncadd (%p1713_p10), %s214_s11, 4294967168 }
  0x48   : > { %1364 = dma.done.wait (%p1481_p1), [#allocation6], 2048  }
  0x49   : > { %1366 = vsyncadd (%p1481_p1), [#allocation6], 4294965248  ;;  %v1407_v0 = vmov 0.0   ;;  %vm1408_vm0 = vmmov 0   ;;  %v252_v1 = vld [vmem:[#allocation5 + $0x18] sm:$0xff]  ;;  %v251_v3 = vld [vmem:[#allocation5 + $0x10] sm:$0xff] }
  0x4a   : > { %1088 = vmatprep.subr.mxu0 %v1407_v0  ;;  %1099 = vmatprep.subr.mxu1 %v1407_v0  ;;  %v333_v2 = vld [vmem:[#allocation5 + $0x38] sm:$0xff]  ;;  %v332_v4 = vld [vmem:[#allocation5 + $0x30] sm:$0xff]  ;;  %v250_v5 = vld [vmem:[#allocation5 + $0x8] sm:$0xff]  ;;  %vm253_vm1 = vcmask 261120   ;;  %vm407_vm2 = vcmask 64512   ;;  %s1028_s9 = sshll.u32 %s1562_s15, 5 }
  0x4b   : > { %1096 = vmatprep.mubr.msk.f32.mxu0 %vm1408_vm0, %v1407_v0  ;;  %1107 = vmatprep.mubr.msk.f32.mxu1 %vm1408_vm0, %v1407_v0  ;;  %v331_v6 = vld [vmem:[#allocation5 + $0x28] sm:$0xff]  ;;  %v249_v7 = vld [vmem:[#allocation5] sm:$0xff]  ;;  %v247_v9 = vld [vmem:[%s217_s24] sm:$0xff]  ;;  %s245_s5 = scalar_lea.vmem [#allocation7], %s1028_s9  ;;  %s1055_s13 = sshll.u32 %s1385_s18, 2 }
  0x4c   : > { %1089 = vmatpush3.msra.mxu0 %v252_v1  ;;  %1100 = vmatpush3.msra.mxu1 %v333_v2  ;;  %v330_v8 = vld [vmem:[#allocation5 + $0x20] sm:$0xff]  ;;  %v327_v11 = vld [vmem:[%s1688_s2] sm:$0xff]  ;;  %v1032_v14 = vld [vmem:[%s1688_s2 + $0x18] sm:$0xff]  ;;  %s1051_s6 = sshll.u32 %s1389_s19, 5  ;;  %s918_s28 = sshll.u32 %s245_s5, 4  ;;  %s1628_s28 = int_to_ptr.vmem [resolvable:$true] %s918_s28 }
  0x4d   : > { %1090 = vmatprep.subr.mxu0 %v1407_v0  ;;  %1101 = vmatprep.subr.mxu1 %v1407_v0  ;;  %v1031_v10 = vld [vmem:[%s1688_s2 + $0x10] sm:$0xff]  ;;  %v328_v15 = vld [vmem:[%s1688_s2 + $0x8] sm:$0xff]  ;;  %v583_v20 = vld [vmem:[#allocation5 + $0x50] sm:$0xff]  ;;  %s915_s7 = sadd.s32 %s1055_s13, %s1051_s6  ;;  %s1715_s19 = sld [smem:[#allocation16_spill]] }
  0x4e   : > { %1091 = vmatpush3.msra.mxu0 %v251_v3  ;;  %1102 = vmatpush3.msra.mxu1 %v332_v4  ;;  %v584_v18 = vld [vmem:[#allocation5 + $0x58] sm:$0xff]  ;;  %v660_v21 = vld [vmem:[#allocation5 + $0x70] sm:$0xff]  ;;  %v582_v22 = vld [vmem:[#allocation5 + $0x48] sm:$0xff]  ;;  %s1052_s24 = sshll.u32 %s915_s7, 7  ;;  %s902_s29 = scalar_lea.sflag [#allocation4], %s1562_s15 }
  0x4f   : > { %1092 = vmatprep.subr.mxu0 %v1407_v0  ;;  %1103 = vmatprep.subr.mxu1 %v1407_v0  ;;  %v661_v19 = vld [vmem:[#allocation5 + $0x78] sm:$0xff]  ;;  %v659_v23 = vld [vmem:[#allocation5 + $0x68] sm:$0xff]  ;;  %v581_v24 = vld [vmem:[#allocation5 + $0x40] sm:$0xff]  ;;  %s1301_s23 = scalar_lea.vmem %s1628_s28, 512  ;;  %s1409_s30 = smov [#allocation7]  }
  0x50   : > { %1093 = vmatpush3.msra.mxu0 %v250_v5  ;;  %1104 = vmatpush3.msra.mxu1 %v331_v6  ;;  %v658_v25 = vld [vmem:[#allocation5 + $0x60] sm:$0xff]  ;;  %v1037_v27 = vld [vmem:[%s1689_s3] ss:$0 sm:$0xff]  ;;  %p1302_p1 = scmp.ne.s32.totalorder %s1628_s28, %s1301_s23  ;;  %s1305_s8 = sshll.u32 %s1409_s30, 4  ;;  %s1306_s8 = int_to_ptr.vmem [resolvable:$false] %s1305_s8 }
  0x51   : > { %1094 = vmatprep.subr.mxu0 %v1407_v0  ;;  %1105 = vmatprep.subr.mxu1 %v1407_v0  ;;  %s1307_s26 = scalar_lea.vmem %s1306_s8, 1024  ;;  %p1308_p2 = scmp.lt.s32.totalorder %s1628_s28, %s1306_s8 }
  0x52   : > { %1095 = vmatpush3.msra.mxu0 %v249_v7  ;;  %1106 = vmatpush3.msra.mxu1 %v330_v8  ;;  %p1303_p8 = pnand %p1302_p1, %p1525_p11  ;;  %p1309_p0 = scmp.lt.s32.totalorder %s1307_s26, %s1301_s23 }
  0x53   : > { %1097 = vmatmul.mubr.msk.f32.vlgmr.msra.gmra.mxu0 %vm253_vm1, %v247_v9  ;;  %1108 = vmatmul.mubr.msk.f32.vlgmr.msra.gmra.mxu1 %vm253_vm1, %v247_v9  ;;  %s1716_s25 = smov %s1715_s19  ;;  %s1633_s27 = scalar_lea.hbm %s1715_s19, %s1052_s24 }
  0x54   : > { %1112 = vmatprep.mubr.msk.f32.mxu0 %vm407_vm2, %v1031_v10  ;;  %1117 = vmatprep.mubr.msk.f32.mxu1 %vm407_vm2, %v327_v11  ;;  %p1304_p12 = pneg %p1303_p8  ;;  %p1310_p3 = por %p1309_p0, %p1308_p2 }
  0x56   : > { %p1311_p5 = pnand %p1310_p3, %p1304_p12 }
 0x113   : > { %v323_v12 = vpop.f32.mrf.mxu0  ;;  %v400_v13 = vpop.f32.mrf.mxu1 }
 0x114   : > { %1110 = vmatprep.subr.mxu0 %v400_v13  ;;  %1115 = vmatprep.subr.mxu1 %v323_v12 }
 0x115   : > { %v1098_v16 = vpop.f32.mrf.mxu0  ;;  %v1109_v17 = vpop.f32.mrf.mxu1  ;;  %1111 = vmatpush3.msra.mxu0 %v400_v13  ;;  %1116 = vmatpush3.msra.mxu1 %v323_v12 }
 0x116   : > { %1113 = vmatmul.mubr.msk.f32.vlgmr.msra.gmra.mxu0 %vm407_vm2, %v1032_v14  ;;  %1118 = vmatmul.mubr.msk.f32.vlgmr.msra.gmra.mxu1 %vm407_vm2, %v328_v15 }
 0x117   : > { %1120 = vmatprep.subr.mxu0 %v1407_v0  ;;  %1131 = vmatprep.subr.mxu1 %v1407_v0 }
 0x118   : > { %1121 = vmatpush3.msra.mxu0 %v584_v18  ;;  %1132 = vmatpush3.msra.mxu1 %v661_v19 }
 0x119   : > { %1122 = vmatprep.subr.mxu0 %v1407_v0  ;;  %1133 = vmatprep.subr.mxu1 %v1407_v0 }
 0x11a   : > { %1123 = vmatpush3.msra.mxu0 %v583_v20  ;;  %1134 = vmatpush3.msra.mxu1 %v660_v21 }
 0x11b   : > { %1124 = vmatprep.subr.mxu0 %v1407_v0  ;;  %1135 = vmatprep.subr.mxu1 %v1407_v0 }
 0x11c   : > { %1125 = vmatpush3.msra.mxu0 %v582_v22  ;;  %1136 = vmatpush3.msra.mxu1 %v659_v23 }
 0x11d   : > { %1126 = vmatprep.subr.mxu0 %v1407_v0  ;;  %1137 = vmatprep.subr.mxu1 %v1407_v0 }
 0x11e   : > { %1127 = vmatpush3.msra.mxu0 %v581_v24  ;;  %1128 = vmatprep.mubr.msk.f32.mxu0 %vm1408_vm0, %v1407_v0 }
 0x11f   : > { %1138 = vmatpush3.msra.mxu1 %v658_v25  ;;  %1139 = vmatprep.mubr.msk.f32.mxu1 %vm1408_vm0, %v1407_v0 }
 0x120   : > { %1129 = vmatmul.mubr.msk.f32.vlgmr.msra.gmra.mxu0 %vm253_vm1, %v247_v9  ;;  %1140 = vmatmul.mubr.msk.f32.vlgmr.msra.gmra.mxu1 %vm253_vm1, %v247_v9 }
 0x121   : > { %1144 = vmatprep.mubr.msk.f32.mxu0 %vm407_vm2, %v1031_v10  ;;  %1149 = vmatprep.mubr.msk.f32.mxu1 %vm407_vm2, %v327_v11 }
 0x1d6   : > { %v1114_v26 = vpop.f32.mrf.mxu0  ;;  %v1119_v28 = vpop.f32.mrf.mxu1 }
 0x1d7   : > { %v567_v29 = vadd.f32 %v1119_v28, %v1114_v26 }
 0x1d8   : > { %v480_v30 = vpop.f32.mrf.mxu0  ;;  %v561_v31 = vpop.f32.mrf.mxu1 }
 0x1d9   : > { %v577_v32 = vadd.f32 %v1037_v27, %v567_v29  ;;  %v562_v33 = vadd.f32 %v561_v31, %v480_v30 }
 0x1db   : > { %579 = vst [vmem:[%s245_s5 + $0x8] sm:$0xff] %v577_v32  ;;  %v576_v34 = vadd.f32 %v1037_v27, %v562_v33 }
 0x1dd   : > { %578 = vst [vmem:[%s245_s5] sm:$0xff] %v576_v34 }
 0x1e0   : > { %v651_v35 = vpop.f32.mrf.mxu0  ;;  %v728_v36 = vpop.f32.mrf.mxu1 }
 0x1e1   : > { %1142 = vmatprep.subr.mxu0 %v728_v36  ;;  %1147 = vmatprep.subr.mxu1 %v651_v35 }
 0x1e2   : > { %v1130_v37 = vpop.f32.mrf.mxu0  ;;  %v1141_v38 = vpop.f32.mrf.mxu1  ;;  %1143 = vmatpush3.msra.mxu0 %v728_v36  ;;  %1148 = vmatpush3.msra.mxu1 %v651_v35 }
 0x1e3   : > { %1145 = vmatmul.mubr.msk.f32.vlgmr.msra.gmra.mxu0 %vm407_vm2, %v1032_v14  ;;  %1150 = vmatmul.mubr.msk.f32.vlgmr.msra.gmra.mxu1 %vm407_vm2, %v328_v15 }
 0x2a3   : > { %v1146_v39 = vpop.f32.mrf.mxu0  ;;  %v1151_v40 = vpop.f32.mrf.mxu1 }
 0x2a4   : > { %v893_v41 = vadd.f32 %v1151_v40, %v1146_v39 }
 0x2a5   : > { %v806_v42 = vpop.f32.mrf.mxu0  ;;  %v887_v43 = vpop.f32.mrf.mxu1 }
 0x2a6   : > { %v897_v44 = vadd.f32 %v1037_v27, %v893_v41  ;;  %v888_v45 = vadd.f32 %v887_v43, %v806_v42 }
 0x2a8   : > { %1047 = vst [vmem:[%s245_s5 + $0x18] sm:$0xff] %v897_v44  ;;  %v896_v46 = vadd.f32 %v1037_v27, %v888_v45 }
 0x2aa   : > { %1046 = vst [vmem:[%s245_s5 + $0x10] sm:$0xff] %v896_v46 }
 0x2ab   : > { %1314 = shalt.err (!%p1311_p5)
}
 0x2ac   : > { %s1315_s9 = scalar_lea.hbm %s1633_s27, 512  ;;  %s1319_s5 = scalar_lea.hbm %s1716_s25, 8192 }
 0x2ad   : > { %p1316_p4 = scmp.ne.s32.totalorder %s1633_s27, %s1315_s9  ;;  %p1320_p9 = scmp.lt.s32.totalorder %s1633_s27, %s1716_s25 }
 0x2ae   : > { %p1321_p13 = scmp.lt.s32.totalorder %s1319_s5, %s1315_s9 }
 0x2af   : > { %p1317_p6 = pnand %p1316_p4, %p1525_p11 }
 0x2b0   : > { %p1322_p10 = por %p1321_p13, %p1320_p9 }
 0x2b1   : > { %p1318_p7 = pneg %p1317_p6 }
 0x2b3   : > { %p1323_p1 = pnand %p1322_p10, %p1318_p7 }
 0x2b5   : > { %1326 = shalt.err (!%p1323_p1)
}
 0x2b6   : > { %s1410_s7 = smov 128   ;;  %s1411_s24 = smov 8  }
 0x2b7   : > { %1158 = dma.vmem_to_hbm [thread:$0]  (%p1525_p11), %s1628_s28, 512, %s1633_s27, %s902_s29, %s1410_s7, %s1410_s7, %s1411_s24  }
 0x2b8 PF: > { %s1717_s4 = sld [smem:[#allocation11_spill]]  ;;  %p1175_p8 = scmp.ge.s32.totalorder %s1401_s22, 2 }
 0x2b9   : > { %s1718_s18 = sld [smem:[#allocation12_spill]] }
 0x2be   : > { %s933_s19 = sand.u32 1, %s1717_s4  }
 0x2bf   : > { %p1719_p12 = scmp.ne.s32.totalorder %s1718_s18, 0  ;;  %s934_s23 = scalar_lea.sflag [#allocation4], %s933_s19 }
 0x2c1   : > { %p1169_p2 = pnand %p1175_p8, %p1719_p12 }
 0x2c3   : > { %p1170_p0 = pneg %p1169_p2 }
 0x2c5   : > { %1368 = dma.done.wait (%p1170_p0), %s934_s23, 512  }
 0x2c6   : > { %1370 = vsyncadd (%p1170_p0), %s934_s23, 4294966784  ;;  %s21_s22 = sadd.s32 1, %s1401_s22   ;;  %s1720_s28 = sld [smem:[#allocation13_spill]] }
 0x2c7   : > { %p18_p3 = scmp.ge.s32.totalorder %s21_s22, 18   ;;  %s1721_s15 = smov %s1377_s16 }
 0x2c8   : > { %s1722_s16 = smov %s1381_s17  ;;  %s1723_s17 = smov %s1542_s1 }
 0x2c9   : > { %s1724_s18 = smov %s1393_s20  ;;  %s1725_s19 = smov %s1397_s21 }
 0x2ca   : > { %s1727_s21 = smov %s1733_s12  ;;  %20 = sbr.rel (!%p18_p3) target bundleno = 11 (0xb), region = 90 }
 0x2cc   : > { %s1726_s20 = smov %s1720_s28 }
 0x2cf   :  { %939 = vsyncpa [#allocation3], 1 }
 0x2d0   :  { %941 = vsyncpa [#allocation3 + $0x1], 1 }
 0x2d1   :  { %942 = vsyncpa [#allocation6], 1 }
 0x2d2   :  { %943 = vsyncpa [#allocation4], 1 }
 0x2d3   :  { %945 = vsyncpa [#allocation4 + $0x1], 1 }

</bundles_post_ra>
